<compile_context>
chip_gen: v6e
topology: v6e:2x2x1
jax: 0.10.0
libtpu: 0.0.40
codegen_flags: <defaults>
</compile_context>

<pallas_src>
import functools

import numpy as np
import jax
import jax.numpy as jnp
from jax.experimental import pallas as pl
from jax.experimental.pallas import tpu as pltpu


# ---------------------------------------------------------------------------
# Pallas kernel
# ---------------------------------------------------------------------------
def _dino_kernel(t0_ref, t1_ref, s_ref, c_ref, loss_ref, center_ref,
                 q_sc, csum_sc, lacc_sc,
                 *, inv_student_temp, inv_teacher_temp, momentum,
                 chunk_b, n_loss_terms):
    bt = pl.program_id(0)     # batch tile
    v = pl.program_id(1)      # student crop index (innermost / fastest)
    nb = pl.num_programs(0)
    ncrops = pl.num_programs(1)

    is_first = jnp.logical_and(bt == 0, v == 0)
    is_last = jnp.logical_and(bt == nb - 1, v == ncrops - 1)

    @pl.when(is_first)
    def _init():
        lacc_sc[0, 0] = jnp.float32(0.0)
        csum_sc[...] = jnp.zeros_like(csum_sc)

    # Teacher softmax for BOTH global crops of batch tile bt (once per bt),
    # plus the column sums feeding the fused center EMA update.
    @pl.when(v == 0)
    def _teacher():
        c = c_ref[...]
        t0 = t0_ref[...]
        t1 = t1_ref[...]
        csum_sc[...] += (jnp.sum(t0, axis=0, keepdims=True)
                         + jnp.sum(t1, axis=0, keepdims=True))

        def _softmax(t):
            tl = (t - c) * jnp.float32(inv_teacher_temp)
            tl = tl - jnp.max(tl, axis=-1, keepdims=True)
            te = jnp.exp(tl)
            # Exact reciprocal ((tile_b, 1) elements only) keeps tight parity
            # with the reference; approx=True would shift it to the EUP slot.
            return te * pl.reciprocal(jnp.sum(te, axis=-1, keepdims=True))

        q_sc[0] = _softmax(t0)
        q_sc[1] = _softmax(t1)

    # Student statistics for crop v / tile bt.  No shifted-logits scratch:
    # the raw student block s_ref stays resident and is reused below.
    s_raw = s_ref[...]
    ss = s_raw * jnp.float32(inv_student_temp)
    m = jnp.max(ss, axis=-1, keepdims=True)
    lse = jnp.log(jnp.sum(jnp.exp(ss - m), axis=-1, keepdims=True))

    # Pair cross entropy, skipping the matching global crop (v == iq), folded
    # into one (tile_b, D) pass over an effective teacher distribution:
    #   sum_d -q * log_softmax(ss) = lse + m - inv_student_temp * sum_d q*s_raw
    # (valid because sum_d q == 1).
    w0 = (v != 0).astype(jnp.float32)
    w1 = (v != 1).astype(jnp.float32)
    q_eff = w0 * q_sc[0] + w1 * q_sc[1]
    ce_sum = ((w0 + w1) * jnp.sum(lse + m)
              - jnp.float32(inv_student_temp) * jnp.sum(q_eff * s_raw))
    lacc_sc[0, 0] += ce_sum * jnp.float32(1.0 / (chunk_b * n_loss_terms))

    # Finalize: scalar loss and EMA-updated center.
    @pl.when(is_last)
    def _finalize():
        loss_ref[0, 0] = lacc_sc[0, 0]
        batch_center = csum_sc[...] * jnp.float32(1.0 / (2 * chunk_b))
        center_ref[...] = (c_ref[...] * jnp.float32(momentum)
                           + batch_center * jnp.float32(1.0 - momentum))


# ---------------------------------------------------------------------------
# Wrapper
# ---------------------------------------------------------------------------
def _vmem_budgets():
    """(block budget bytes, scoped VMEM limit bytes), generation-aware."""
    try:
        physical = int(pltpu.get_tpu_info().vmem_capacity_bytes)
    except Exception:
        physical = 64 << 20   # conservative (v7x-sized) fallback
    block_budget = int(physical * 0.6)   # for the ~8 live block-sized buffers
    vmem_limit = int(physical * 0.75)    # explicit scoped limit for Mosaic
    return block_budget, vmem_limit


def _pick_tile_b(b, d, block_budget_bytes):
    """Largest multiple-of-8 divisor of b such that the ~8 live (tile_b, d)
    f32 buffers (double-buffered teacher x2 + student inputs, 2-deep teacher
    softmax cache, plus slack for (1, d) vectors) fit the VMEM budget."""
    per_block = max(block_budget_bytes // 9, 1)
    divisors = [t for t in range(8, b + 1, 8) if b % t == 0]
    if not divisors:
        raise ValueError("per-crop batch must be a multiple of 8")
    fitting = [t for t in divisors if t * d * 4 <= per_block]
    return max(fitting) if fitting else min(divisors)


def dino_loss_forward(student, teacher, center, *, ncrops, student_temp,
                      teacher_temp, center_momentum, tile_b=None):
    """Returns (total_loss scalar, new_center (1, D)) in one fused pallas_call."""
    two_b, d = teacher.shape
    assert two_b % 2 == 0
    b = two_b // 2
    assert ncrops >= 2
    assert student.shape == (ncrops * b, d)
    assert center.shape == (1, d)
    assert b % 8 == 0, "per-crop batch must be a multiple of 8"

    block_budget, vmem_limit = _vmem_budgets()
    if tile_b is None:
        tile_b = _pick_tile_b(b, d, block_budget)
    assert b % tile_b == 0 and tile_b % 8 == 0
    nb = b // tile_b
    n_loss_terms = 2 * ncrops - 2

    kernel = functools.partial(
        _dino_kernel,
        inv_student_temp=1.0 / student_temp,
        inv_teacher_temp=1.0 / teacher_temp,
        momentum=center_momentum,
        chunk_b=b,
        n_loss_terms=n_loss_terms,
    )

    # Teacher is passed twice (global crop 0 / 1) with index maps constant
    # across v -> each (tile_b, d) teacher block is DMA'd exactly once per bt
    # (total teacher traffic = 2*B*D*4 bytes, the minimum).
    t0_spec = pl.BlockSpec((tile_b, d), lambda bt, v: (bt, 0))
    t1_spec = pl.BlockSpec((tile_b, d), lambda bt, v: (nb + bt, 0))
    # Student chunk v, batch tile bt (DMA'd once per grid step, the minimum).
    s_spec = pl.BlockSpec((tile_b, d), lambda bt, v: (v * nb + bt, 0))
    c_spec = pl.BlockSpec((1, d), lambda bt, v: (0, 0))

    loss, new_center = pl.pallas_call(
        kernel,
        out_shape=(
            jax.ShapeDtypeStruct((1, 1), jnp.float32),   # total loss
            jax.ShapeDtypeStruct((1, d), jnp.float32),   # updated center
        ),
        grid_spec=pltpu.PrefetchScalarGridSpec(
            num_scalar_prefetch=0,
            grid=(nb, ncrops),
            in_specs=[t0_spec, t1_spec, s_spec, c_spec],
            out_specs=[
                pl.BlockSpec((1, 1), lambda bt, v: (0, 0),
                             memory_space=pltpu.MemorySpace.SMEM),
                pl.BlockSpec((1, d), lambda bt, v: (0, 0)),
            ],
            scratch_shapes=[
                pltpu.VMEM((2, tile_b, d), jnp.float32),   # teacher softmax cache
                pltpu.VMEM((1, d), jnp.float32),           # teacher column sums
                pltpu.SMEM((1, 1), jnp.float32),           # loss accumulator
            ],
        ),
        compiler_params=pltpu.CompilerParams(
            dimension_semantics=("arbitrary", "arbitrary"),
            vmem_limit_bytes=vmem_limit),
    )(teacher, teacher, student, center)
    return loss[0, 0], new_center


class DINOLossPallas:
    """Pallas/TPU port of DINOLoss (forward + fused center EMA update)."""

    def __init__(self, out_dim, ncrops, warmup_teacher_temp, teacher_temp,
                 warmup_teacher_temp_epochs, nepochs,
                 student_temp=0.1, center_momentum=0.9, tile_b=None):
        self.student_temp = student_temp
        self.center_momentum = center_momentum
        self.ncrops = ncrops
        self.tile_b = tile_b
        self.center = jnp.zeros((1, out_dim), jnp.float32)
        self.teacher_temp_schedule = np.concatenate((
            np.linspace(warmup_teacher_temp, teacher_temp, warmup_teacher_temp_epochs),
            np.ones(nepochs - warmup_teacher_temp_epochs) * teacher_temp,
        ))

    def __call__(self, student_output, teacher_output, epoch):
        temp = float(self.teacher_temp_schedule[epoch])
        loss, new_center = dino_loss_forward(
            student_output, teacher_output, self.center,
            ncrops=self.ncrops, student_temp=self.student_temp,
            teacher_temp=temp, center_momentum=self.center_momentum,
            tile_b=self.tile_b,
        )
        # Eager state update; under jit/scan keep the returned center functional.
        self.center = new_center
        return loss


# ---------------------------------------------------------------------------
# Pure-JAX reference for verification
# ---------------------------------------------------------------------------
def _ref_forward(student, teacher, center, ncrops, student_temp, teacher_temp,
                 center_momentum):
    s = student / student_temp
    s_chunks = jnp.split(s, ncrops, axis=0)
    t = jax.nn.softmax((teacher - center) / teacher_temp, axis=-1)
    t_chunks = jnp.split(t, 2, axis=0)
    total, n = 0.0, 0
    for iq, q in enumerate(t_chunks):
        for v in range(ncrops):
            if v == iq:
                continue
            loss = jnp.sum(-q * jax.nn.log_softmax(s_chunks[v], axis=-1), axis=-1)
            total = total + loss.mean()
            n += 1
    total = total / n
    batch_center = jnp.sum(teacher, axis=0, keepdims=True) / teacher.shape[0]
    new_center = center * center_momentum + batch_center * (1.0 - center_momentum)
    return total, new_center


# ---------------------------------------------------------------------------
# Demo
# ---------------------------------------------------------------------------
if __name__ == "__main__":
    out_dim = 256        # feature (lane) dim
    ncrops = 4           # 2 global + 2 local crops
    batch_per_crop = 16  # per-crop batch; tile_b=8 exercises the batch-tiled path
    nepochs = 10
    epoch = 1

    loss_mod = DINOLossPallas(
        out_dim=out_dim, ncrops=ncrops,
        warmup_teacher_temp=0.04, teacher_temp=0.07,
        warmup_teacher_temp_epochs=3, nepochs=nepochs,
        student_temp=0.1, center_momentum=0.9, tile_b=8,
    )
    # Deterministic non-zero center so the (x - center) path is exercised.
    key = jax.random.PRNGKey(0)
    k_s, k_t, k_c = jax.random.split(key, 3)
    loss_mod.center = 0.05 * jax.random.normal(k_c, (1, out_dim), jnp.float32)
    center_before = loss_mod.center

    student_output = jax.random.normal(
        k_s, (ncrops * batch_per_crop, out_dim), jnp.float32)
    teacher_output = jax.random.normal(
        k_t, (2 * batch_per_crop, out_dim), jnp.float32)

    loss = loss_mod(student_output, teacher_output, epoch)
    loss = jax.block_until_ready(loss)
    new_center = jax.block_until_ready(loss_mod.center)

    ref_loss, ref_center = _ref_forward(
        student_output, teacher_output, center_before, ncrops,
        loss_mod.student_temp, float(loss_mod.teacher_temp_schedule[epoch]),
        loss_mod.center_momentum,
    )
    np.testing.assert_allclose(np.asarray(loss), np.asarray(ref_loss),
                               rtol=2e-5, atol=2e-5)
    np.testing.assert_allclose(np.asarray(new_center), np.asarray(ref_center),
                               rtol=2e-5, atol=2e-5)
    print("KERNEL_OK")
</pallas_src>

<mosaic_0001>
module attributes {stable_mosaic.version = 11 : i64} {
  func.func @_dino_kernel(%arg0: i32, %arg1: i32, %arg2: memref<8x256xf32, #tpu.memory_space<vmem>>, %arg3: memref<8x256xf32, #tpu.memory_space<vmem>>, %arg4: memref<8x256xf32, #tpu.memory_space<vmem>>, %arg5: memref<1x256xf32, #tpu.memory_space<vmem>>, %arg6: memref<1x1xf32, #tpu.memory_space<smem>>, %arg7: memref<1x256xf32, #tpu.memory_space<vmem>>, %arg8: memref<2x8x256xf32, #tpu.memory_space<vmem>>, %arg9: memref<1x256xf32, #tpu.memory_space<vmem>>, %arg10: memref<1x1xf32, #tpu.memory_space<smem>>) attributes {dimension_semantics = [#tpu.dimension_semantics<arbitrary>, #tpu.dimension_semantics<arbitrary>], iteration_bounds = array<i64: 2, 4>, scalar_prefetch = 0 : i64, scratch_operands = 3 : i64, tpu.core_type = #tpu.core_type<tc>, window_params = [{transform_indices = @transform_0, window_bounds = array<i64: 8, 256>}, {transform_indices = @transform_1, window_bounds = array<i64: 8, 256>}, {transform_indices = @transform_2, window_bounds = array<i64: 8, 256>}, {pipeline_mode = #tpu.pipeline_mode<synchronous>, transform_indices = @transform_3, window_bounds = array<i64: 1, 256>}, {transform_indices = @transform_4, window_bounds = array<i64: 1, 1>}, {pipeline_mode = #tpu.pipeline_mode<synchronous>, transform_indices = @transform_5, window_bounds = array<i64: 1, 256>}]} {
    %c0_i32 = arith.constant 0 : i32
    %0 = arith.cmpi eq, %arg0, %c0_i32 : i32
    %c0_i32_0 = arith.constant 0 : i32
    %1 = arith.cmpi eq, %arg1, %c0_i32_0 : i32
    %2 = arith.andi %0, %1 : i1
    %c1_i32 = arith.constant 1 : i32
    %3 = arith.cmpi eq, %arg0, %c1_i32 : i32
    %c3_i32 = arith.constant 3 : i32
    %4 = arith.cmpi eq, %arg1, %c3_i32 : i32
    %5 = arith.andi %3, %4 : i1
    %6 = arith.extui %2 : i1 to i32
    %c0_i32_1 = arith.constant 0 : i32
    %7 = arith.cmpi ne, %6, %c0_i32_1 : i32
    scf.if %7 {
      %cst_23 = arith.constant 0.000000e+00 : f32
      %c0_24 = arith.constant 0 : index
      %c0_25 = arith.constant 0 : index
      %57 = memref.load %arg10[%c0_24, %c0_25] : memref<1x1xf32, #tpu.memory_space<smem>>
      memref.store %cst_23, %arg10[%c0_24, %c0_25] : memref<1x1xf32, #tpu.memory_space<smem>>
      %cst_26 = arith.constant 0.000000e+00 : f32
      %58 = vector.broadcast %cst_26 : f32 to vector<1x256xf32>
      %c0_27 = arith.constant 0 : index
      %c0_28 = arith.constant 0 : index
      %59 = vector.load %arg9[%c0_27, %c0_28] : memref<1x256xf32, #tpu.memory_space<vmem>>, vector<1x256xf32>
      tpu.vector_store %arg9[%c0_27, %c0_28], %58 {strides = array<i32>} : memref<1x256xf32, #tpu.memory_space<vmem>>, vector<1x256xf32>,
    } else {
    }
    %c0_i32_2 = arith.constant 0 : i32
    %8 = arith.cmpi eq, %arg1, %c0_i32_2 : i32
    %9 = arith.extui %8 : i1 to i32
    %c0_i32_3 = arith.constant 0 : i32
    %10 = arith.cmpi ne, %9, %c0_i32_3 : i32
    scf.if %10 {
      %c0_23 = arith.constant 0 : index
      %c0_24 = arith.constant 0 : index
      %57 = vector.load %arg5[%c0_23, %c0_24] : memref<1x256xf32, #tpu.memory_space<vmem>>, vector<1x256xf32>
      %c0_25 = arith.constant 0 : index
      %c0_26 = arith.constant 0 : index
      %58 = vector.load %arg2[%c0_25, %c0_26] : memref<8x256xf32, #tpu.memory_space<vmem>>, vector<8x256xf32>
      %c0_27 = arith.constant 0 : index
      %c0_28 = arith.constant 0 : index
      %59 = vector.load %arg3[%c0_27, %c0_28] : memref<8x256xf32, #tpu.memory_space<vmem>>, vector<8x256xf32>
      %c0_29 = arith.constant 0 : index
      %c0_30 = arith.constant 0 : index
      %60 = vector.load %arg9[%c0_29, %c0_30] : memref<1x256xf32, #tpu.memory_space<vmem>>, vector<1x256xf32>
      %cst_31 = arith.constant dense<0.000000e+00> : vector<256xf32>
      %61 = vector.multi_reduction <add>, %58, %cst_31 [0] : vector<8x256xf32> to vector<256xf32>
      %62 = vector.shape_cast %61 : vector<256xf32> to vector<1x256xf32>
      %cst_32 = arith.constant dense<0.000000e+00> : vector<256xf32>
      %63 = vector.multi_reduction <add>, %59, %cst_32 [0] : vector<8x256xf32> to vector<256xf32>
      %64 = vector.shape_cast %63 : vector<256xf32> to vector<1x256xf32>
      %65 = arith.addf %62, %64 : vector<1x256xf32>
      %66 = arith.addf %60, %65 : vector<1x256xf32>
      %c0_33 = arith.constant 0 : index
      %c0_34 = arith.constant 0 : index
      %67 = vector.load %arg9[%c0_33, %c0_34] : memref<1x256xf32, #tpu.memory_space<vmem>>, vector<1x256xf32>
      tpu.vector_store %arg9[%c0_33, %c0_34], %66 {strides = array<i32>} : memref<1x256xf32, #tpu.memory_space<vmem>>, vector<1x256xf32>,
      %68 = vector.broadcast %57 : vector<1x256xf32> to vector<8x256xf32>
      %69 = arith.subf %58, %68 : vector<8x256xf32>
      %cst_35 = arith.constant 18.181818 : f32
      %70 = vector.broadcast %cst_35 : f32 to vector<8x256xf32>
      %71 = arith.mulf %69, %70 : vector<8x256xf32>
      %cst_36 = arith.constant dense<0xFF800000> : vector<8xf32>
      %72 = vector.multi_reduction <maximumf>, %71, %cst_36 [1] : vector<8x256xf32> to vector<8xf32>
      %73 = vector.shape_cast %72 : vector<8xf32> to vector<8x1xf32>
      %74 = vector.broadcast %73 : vector<8x1xf32> to vector<8x256xf32>
      %75 = arith.subf %71, %74 : vector<8x256xf32>
      %76 = math.exp %75 : vector<8x256xf32>
      %cst_37 = arith.constant dense<0.000000e+00> : vector<8xf32>
      %77 = vector.multi_reduction <add>, %76, %cst_37 [1] : vector<8x256xf32> to vector<8xf32>
      %78 = vector.shape_cast %77 : vector<8xf32> to vector<8x1xf32>
      %79 = tpu.reciprocal %78 : vector<8x1xf32> -> vector<8x1xf32>
      %80 = vector.broadcast %79 : vector<8x1xf32> to vector<8x256xf32>
      %81 = arith.mulf %76, %80 : vector<8x256xf32>
      %c0_38 = arith.constant 0 : index
      %c0_39 = arith.constant 0 : index
      %c0_40 = arith.constant 0 : index
      %82 = vector.load %arg8[%c0_38, %c0_39, %c0_40] : memref<2x8x256xf32, #tpu.memory_space<vmem>>, vector<1x8x256xf32>
      %83 = vector.shape_cast %82 : vector<1x8x256xf32> to vector<8x256xf32>
      %84 = vector.shape_cast %81 : vector<8x256xf32> to vector<1x8x256xf32>
      tpu.vector_store %arg8[%c0_38, %c0_39, %c0_40], %84 {strides = array<i32>} : memref<2x8x256xf32, #tpu.memory_space<vmem>>, vector<1x8x256xf32>,
      %85 = vector.broadcast %57 : vector<1x256xf32> to vector<8x256xf32>
      %86 = arith.subf %59, %85 : vector<8x256xf32>
      %cst_41 = arith.constant 18.181818 : f32
      %87 = vector.broadcast %cst_41 : f32 to vector<8x256xf32>
      %88 = arith.mulf %86, %87 : vector<8x256xf32>
      %cst_42 = arith.constant dense<0xFF800000> : vector<8xf32>
      %89 = vector.multi_reduction <maximumf>, %88, %cst_42 [1] : vector<8x256xf32> to vector<8xf32>
      %90 = vector.shape_cast %89 : vector<8xf32> to vector<8x1xf32>
      %91 = vector.broadcast %90 : vector<8x1xf32> to vector<8x256xf32>
      %92 = arith.subf %88, %91 : vector<8x256xf32>
      %93 = math.exp %92 : vector<8x256xf32>
      %cst_43 = arith.constant dense<0.000000e+00> : vector<8xf32>
      %94 = vector.multi_reduction <add>, %93, %cst_43 [1] : vector<8x256xf32> to vector<8xf32>
      %95 = vector.shape_cast %94 : vector<8xf32> to vector<8x1xf32>
      %96 = tpu.reciprocal %95 : vector<8x1xf32> -> vector<8x1xf32>
      %97 = vector.broadcast %96 : vector<8x1xf32> to vector<8x256xf32>
      %98 = arith.mulf %93, %97 : vector<8x256xf32>
      %c1_44 = arith.constant 1 : index
      %c0_45 = arith.constant 0 : index
      %c0_46 = arith.constant 0 : index
      %99 = vector.load %arg8[%c1_44, %c0_45, %c0_46] : memref<2x8x256xf32, #tpu.memory_space<vmem>>, vector<1x8x256xf32>
      %100 = vector.shape_cast %99 : vector<1x8x256xf32> to vector<8x256xf32>
      %101 = vector.shape_cast %98 : vector<8x256xf32> to vector<1x8x256xf32>
      tpu.vector_store %arg8[%c1_44, %c0_45, %c0_46], %101 {strides = array<i32>} : memref<2x8x256xf32, #tpu.memory_space<vmem>>, vector<1x8x256xf32>,
    } else {
    }
    %c0 = arith.constant 0 : index
    %c0_4 = arith.constant 0 : index
    %11 = vector.load %arg4[%c0, %c0_4] : memref<8x256xf32, #tpu.memory_space<vmem>>, vector<8x256xf32>
    %cst = arith.constant 1.000000e+01 : f32
    %12 = vector.broadcast %cst : f32 to vector<8x256xf32>
    %13 = arith.mulf %11, %12 : vector<8x256xf32>
    %cst_5 = arith.constant dense<0xFF800000> : vector<8xf32>
    %14 = vector.multi_reduction <maximumf>, %13, %cst_5 [1] : vector<8x256xf32> to vector<8xf32>
    %15 = vector.shape_cast %14 : vector<8xf32> to vector<8x1xf32>
    %16 = vector.broadcast %15 : vector<8x1xf32> to vector<8x256xf32>
    %17 = arith.subf %13, %16 : vector<8x256xf32>
    %18 = math.exp %17 : vector<8x256xf32>
    %cst_6 = arith.constant dense<0.000000e+00> : vector<8xf32>
    %19 = vector.multi_reduction <add>, %18, %cst_6 [1] : vector<8x256xf32> to vector<8xf32>
    %20 = vector.shape_cast %19 : vector<8xf32> to vector<8x1xf32>
    %21 = math.log %20 : vector<8x1xf32>
    %c0_i32_7 = arith.constant 0 : i32
    %22 = arith.cmpi ne, %arg1, %c0_i32_7 : i32
    %23 = arith.extui %22 : i1 to i32
    %24 = arith.sitofp %23 : i32 to f32
    %c1_i32_8 = arith.constant 1 : i32
    %25 = arith.cmpi ne, %arg1, %c1_i32_8 : i32
    %26 = arith.extui %25 : i1 to i32
    %27 = arith.sitofp %26 : i32 to f32
    %c0_9 = arith.constant 0 : index
    %c0_10 = arith.constant 0 : index
    %c0_11 = arith.constant 0 : index
    %28 = vector.load %arg8[%c0_9, %c0_10, %c0_11] : memref<2x8x256xf32, #tpu.memory_space<vmem>>, vector<1x8x256xf32>
    %29 = vector.shape_cast %28 : vector<1x8x256xf32> to vector<8x256xf32>
    %30 = vector.broadcast %24 : f32 to vector<8x256xf32>
    %31 = arith.mulf %30, %29 : vector<8x256xf32>
    %c1 = arith.constant 1 : index
    %c0_12 = arith.constant 0 : index
    %c0_13 = arith.constant 0 : index
    %32 = vector.load %arg8[%c1, %c0_12, %c0_13] : memref<2x8x256xf32, #tpu.memory_space<vmem>>, vector<1x8x256xf32>
    %33 = vector.shape_cast %32 : vector<1x8x256xf32> to vector<8x256xf32>
    %34 = vector.broadcast %27 : f32 to vector<8x256xf32>
    %35 = arith.mulf %34, %33 : vector<8x256xf32>
    %36 = arith.addf %31, %35 : vector<8x256xf32>
    %37 = arith.addf %24, %27 : f32
    %38 = arith.addf %21, %15 : vector<8x1xf32>
    %39 = vector.shape_cast %38 : vector<8x1xf32> to vector<1x8x1xf32>
    %cst_14 = arith.constant dense<0.000000e+00> : vector<1xf32>
    %40 = vector.multi_reduction <add>, %39, %cst_14 [1, 2] : vector<1x8x1xf32> to vector<1xf32>
    %41 = vector.shape_cast %40 : vector<1xf32> to vector<1x1x1xf32>
    %42 = vector.extract %41[0, 0, 0] : f32 from vector<1x1x1xf32>
    %43 = arith.mulf %37, %42 : f32
    %44 = arith.mulf %36, %11 : vector<8x256xf32>
    %45 = vector.shape_cast %44 : vector<8x256xf32> to vector<1x8x256xf32>
    %cst_15 = arith.constant dense<0.000000e+00> : vector<1xf32>
    %46 = vector.multi_reduction <add>, %45, %cst_15 [1, 2] : vector<1x8x256xf32> to vector<1xf32>
    %47 = vector.shape_cast %46 : vector<1xf32> to vector<1x1x1xf32>
    %48 = vector.extract %47[0, 0, 0] : f32 from vector<1x1x1xf32>
    %cst_16 = arith.constant 1.000000e+01 : f32
    %49 = arith.mulf %cst_16, %48 : f32
    %50 = arith.subf %43, %49 : f32
    %c0_17 = arith.constant 0 : index
    %c0_18 = arith.constant 0 : index
    %51 = memref.load %arg10[%c0_17, %c0_18] : memref<1x1xf32, #tpu.memory_space<smem>>
    %cst_19 = arith.constant 0.010416667 : f32
    %52 = arith.mulf %50, %cst_19 : f32
    %53 = arith.addf %51, %52 : f32
    %c0_20 = arith.constant 0 : index
    %c0_21 = arith.constant 0 : index
    %54 = memref.load %arg10[%c0_20, %c0_21] : memref<1x1xf32, #tpu.memory_space<smem>>
    memref.store %53, %arg10[%c0_20, %c0_21] : memref<1x1xf32, #tpu.memory_space<smem>>
    %55 = arith.extui %5 : i1 to i32
    %c0_i32_22 = arith.constant 0 : i32
    %56 = arith.cmpi ne, %55, %c0_i32_22 : i32
    scf.if %56 {
      %c0_23 = arith.constant 0 : index
      %c0_24 = arith.constant 0 : index
      %57 = memref.load %arg10[%c0_23, %c0_24] : memref<1x1xf32, #tpu.memory_space<smem>>
      %c0_25 = arith.constant 0 : index
      %c0_26 = arith.constant 0 : index
      %58 = memref.load %arg6[%c0_25, %c0_26] : memref<1x1xf32, #tpu.memory_space<smem>>
      memref.store %57, %arg6[%c0_25, %c0_26] : memref<1x1xf32, #tpu.memory_space<smem>>
      %c0_27 = arith.constant 0 : index
      %c0_28 = arith.constant 0 : index
      %59 = vector.load %arg9[%c0_27, %c0_28] : memref<1x256xf32, #tpu.memory_space<vmem>>, vector<1x256xf32>
      %cst_29 = arith.constant 3.125000e-02 : f32
      %60 = vector.broadcast %cst_29 : f32 to vector<1x256xf32>
      %61 = arith.mulf %59, %60 : vector<1x256xf32>
      %c0_30 = arith.constant 0 : index
      %c0_31 = arith.constant 0 : index
      %62 = vector.load %arg5[%c0_30, %c0_31] : memref<1x256xf32, #tpu.memory_space<vmem>>, vector<1x256xf32>
      %cst_32 = arith.constant 0.899999976 : f32
      %63 = vector.broadcast %cst_32 : f32 to vector<1x256xf32>
      %64 = arith.mulf %62, %63 : vector<1x256xf32>
      %cst_33 = arith.constant 1.000000e-01 : f32
      %65 = vector.broadcast %cst_33 : f32 to vector<1x256xf32>
      %66 = arith.mulf %61, %65 : vector<1x256xf32>
      %67 = arith.addf %64, %66 : vector<1x256xf32>
      %c0_34 = arith.constant 0 : index
      %c0_35 = arith.constant 0 : index
      %68 = vector.load %arg7[%c0_34, %c0_35] : memref<1x256xf32, #tpu.memory_space<vmem>>, vector<1x256xf32>
      tpu.vector_store %arg7[%c0_34, %c0_35], %67 {strides = array<i32>} : memref<1x256xf32, #tpu.memory_space<vmem>>, vector<1x256xf32>,
    } else {
    }
    return
  }
  func.func @transform_0(%arg0: i32, %arg1: i32) -> (i32, i32) {
    %c0_i32 = arith.constant 0 : i32
    %c0_i32_0 = arith.constant 0 : i32
    return %arg0, %c0_i32 : i32, i32
  }
  func.func @transform_1(%arg0: i32, %arg1: i32) -> (i32, i32) {
    %c2_i32 = arith.constant 2 : i32
    %0 = arith.addi %c2_i32, %arg0 : i32
    %c0_i32 = arith.constant 0 : i32
    %c0_i32_0 = arith.constant 0 : i32
    return %0, %c0_i32 : i32, i32
  }
  func.func @transform_2(%arg0: i32, %arg1: i32) -> (i32, i32) {
    %c2_i32 = arith.constant 2 : i32
    %0 = arith.muli %arg1, %c2_i32 : i32
    %1 = arith.addi %0, %arg0 : i32
    %c0_i32 = arith.constant 0 : i32
    %c0_i32_0 = arith.constant 0 : i32
    return %1, %c0_i32 : i32, i32
  }
  func.func @transform_3(%arg0: i32, %arg1: i32) -> (i32, i32) {
    %c0_i32 = arith.constant 0 : i32
    %c0_i32_0 = arith.constant 0 : i32
    %c0_i32_1 = arith.constant 0 : i32
    return %c0_i32, %c0_i32_0 : i32, i32
  }
  func.func @transform_4(%arg0: i32, %arg1: i32) -> (i32, i32) {
    %c0_i32 = arith.constant 0 : i32
    %c0_i32_0 = arith.constant 0 : i32
    %c0_i32_1 = arith.constant 0 : i32
    return %c0_i32, %c0_i32_0 : i32, i32
  }
  func.func @transform_5(%arg0: i32, %arg1: i32) -> (i32, i32) {
    %c0_i32 = arith.constant 0 : i32
    %c0_i32_0 = arith.constant 0 : i32
    %c0_i32_1 = arith.constant 0 : i32
    return %c0_i32, %c0_i32_0 : i32, i32
  }
}

</mosaic_0001>

<bundles_post_ra>
// kernel: tpu_custom_call.1
= control target key start
LH: loop header
LB: loop body
LE: loop exit
PB: predicated region body
PF: predicated region fallthrough
CT: control target
= control target key end

     0   :  { %s1511_s0 = inlined_call_operand.hbm [shape: f32[32,256], index: 0, kind: input, shape index: {}]   ;;  %s1512_s1 = inlined_call_operand.hbm [shape: f32[32,256], index: 1, kind: input, shape index: {}]   ;;  %s1513_s2 = inlined_call_operand.hbm [shape: f32[64,256], index: 2, kind: input, shape index: {}]   ;;  %s1514_s3 = inlined_call_operand.vmem [shape: f32[1,256], index: 3, kind: input, shape index: {}]   ;;  %s1515_s4 = inlined_call_operand.hbm [shape: f32[1,1], index: 4, kind: output, shape index: {0}]   ;;  %s1516_s5 = inlined_call_operand.hbm [shape: f32[1,256], index: 5, kind: output, shape index: {1}]  }
   0x1   :  { %1532 = sst [smem:[#allocation28_spill]] %s1511_s0 }
   0x2   :  { %1533 = sst [smem:[#allocation29_spill]] %s1512_s1 }
   0x3   :  { %1534 = sst [smem:[#allocation30_spill]] %s1514_s3 }
   0x4   :  { %1535 = sst [smem:[#allocation31_spill]] %s1515_s4 }
   0x5   :  { %1536 = sst [smem:[#allocation32_spill]] %s1516_s5 }
   0x6   :  { %11 = vsyncpa [#allocation6], 0 }
   0x7   :  { %13 = vsyncpa [#allocation6 + $0x1], 0 }
   0x8   :  { %14 = vsyncpa [#allocation10], 0 }
   0x9   :  { %16 = vsyncpa [#allocation10 + $0x1], 0 }
   0xa   :  { %17 = vsyncpa [#allocation8], 0 }
   0xb   :  { %18 = vsyncpa [#allocation7], 0  ;;  %s1163_s18 = smov 0   ;;  %s1165_s19 = smov 0  }
   0xc   :  { %s1167_s20 = smov 0   ;;  %s1169_s21 = smov 0  }
   0xd   :  { %s1171_s22 = smov 0   ;;  %s1173_s23 = smov 0  }
   0xe   :  { %s1175_s24 = smov 0   ;;  %s1177_s25 = smov 0  }
   0xf   :  { %s1179_s26 = smov 0   ;;  %s1181_s27 = smov 0  }
  0x10   :  { %s1183_s28 = smov 0   ;;  %s1185_s29 = smov 0  }
  0x11   :  { %s1187_s30 = smov 0   ;;  %s1189_s6 = smov 0  }
  0x12 LB: > { %1537 = sst [smem:[#allocation19_spill]] %s1075_s19  ;;  %s1232_s7 = sadd.s32 4294967295, %s1123_s6   ;;  %s1123_s6 = sphi %s1189_s6, %s24_s6   ;;  %s1119_s30 = sphi %s1187_s30, %s1589_s30   ;;  %s1115_s29 = sphi %s1185_s29, %s1579_s29   ;;  %s1111_s28 = sphi %s1183_s28, %s1578_s28   ;;  %s1107_s27 = sphi %s1181_s27, %s1577_s27   ;;  %s1103_s26 = sphi %s1179_s26, %s1588_s26   ;;  %s1099_s25 = sphi %s1177_s25, %s1587_s25   ;;  %s1095_s24 = sphi %s1175_s24, %s1586_s24   ;;  %s1091_s23 = sphi %s1173_s23, %s1585_s23   ;;  %s1087_s22 = sphi %s1171_s22, %s1584_s22   ;;  %s1083_s21 = sphi %s1169_s21, %s1583_s21   ;;  %s1079_s20 = sphi %s1167_s20, %s1582_s20   ;;  %s1075_s19 = sphi %s1165_s19, %s1581_s19   ;;  %s1071_s18 = sphi %s1163_s18, %s1575_s18  }
  0x13   : > { %1538 = sst [smem:[#allocation20_spill]] %s1087_s22  ;;  %p51_p0 = scmp.eq.s32.totalorder %s1123_s6, 0 }
  0x14   : > { %1539 = sst [smem:[#allocation21_spill]] %s1107_s27  ;;  %p57_p1 = scmp.eq.s32.totalorder %s1232_s7, 0 }
  0x15   : > { %1540 = sst [smem:[#allocation22_spill]] %s1111_s28  ;;  %p78_p2 = scmp.ne.s32.totalorder %s1091_s23, %s1087_s22 }
  0x16   : > { %1541 = sst [smem:[#allocation23_spill]] %s1115_s29  ;;  %p84_p3 = scmp.ne.s32.totalorder %s1087_s22, %s1083_s21 }
  0x17   : > { %1542 = sst [smem:[#allocation24_spill]] %s1119_s30  ;;  %p1517_p4 = scmp.lt.s32.totalorder %s1123_s6, 8 }
  0x18   : > { %p80_p5 = por %p78_p2, %p51_p0  ;;  %p1245_p6 = por %p84_p3, %p57_p1 }
  0x19   : > { %s704_s10 = sshll.u32 %s1119_s30, 8  ;;  %s223_s11 = sand.u32 1, %s1123_s6  }
  0x1a   : > { %s1543_s9 = scalar_select %p1245_p6, 1, 0 }
  0x1b   : > { %s225_s12 = sand.u32 1, %s1091_s23   ;;  %s1545_s1 = sld [smem:[#allocation29_spill]] }
  0x1c   : > { %1544 = sst [smem:[#allocation25_spill]] %s1543_s9  ;;  %s687_s13 = sshll.u32 %s225_s12, 4 }
  0x1d   : > { %s227_s8 = scalar_lea.vmem [#allocation9], %s687_s13  ;;  %p1259_p7 = pnand %p1517_p4, %p80_p5 }
  0x1e   : > { %s236_s21 = sshll.u32 %s227_s8, 4  ;;  %p693_p8 = scmp.ge.s32.totalorder %s1123_s6, 1  ;;  %s237_s21 = int_to_ptr.vmem [resolvable:$true] %s236_s21 }
  0x1f   : > { %p262_p9 = scmp.lt.s32.totalorder %s1123_s6, 9  ;;  %s1265_s4 = scalar_lea.sflag [#allocation10], %s223_s11 }
  0x20   : > { %p876_p10 = pneg %p1259_p7  ;;  %s887_s12 = scalar_lea.vmem %s237_s21, 256 }
  0x21   : > { %s596_s16 = scalar_lea.hbm %s1545_s1, %s704_s10  ;;  %p888_p11 = scmp.ne.s32.totalorder %s237_s21, %s887_s12 }
  0x22   : > { %s597_s17 = scalar_lea.hbm %s596_s16, 512  ;;  %s1125_s14 = smov [#allocation9]  }
  0x23   : > { %p890_p12 = pnand %p888_p11, %p876_p10  ;;  %s892_s13 = sshll.u32 %s1125_s14, 4  ;;  %s893_s13 = int_to_ptr.vmem [resolvable:$false] %s892_s13 }
  0x24   : > { %s894_s8 = scalar_lea.vmem %s893_s13, 512  ;;  %p895_p2 = scmp.lt.s32.totalorder %s237_s21, %s893_s13 }
  0x25   : > { %p891_p13 = pneg %p890_p12  ;;  %p896_p3 = scmp.lt.s32.totalorder %s894_s8, %s887_s12 }
  0x27   : > { %p897_p5 = por %p896_p3, %p895_p2 }
  0x29   : > { %p898_p4 = pnand %p897_p5, %p891_p13 }
  0x2b   : > { %901 = shalt.err (!%p898_p4)
}
  0x2c   : > { %730 = dma.hbm_to_vmem [thread:$0]  (!%p1259_p7), %s597_s17, 256, %s237_s21, %s1265_s4  }
  0x2d   : > { %p1276_p10 = pnand %p693_p8, %p262_p9  ;;  %p50_p4 = scmp.ne.s32.totalorder %s1103_s26, %s1099_s25 }
  0x2e   : > { %p56_p11 = scmp.ne.s32.totalorder %s1099_s25, %s1095_s24  ;;  %s204_s15 = sand.u32 1, %s1103_s26  }
  0x2f   : > { %s1548_s0 = sld [smem:[#allocation28_spill]]  ;;  %p52_p12 = por %p51_p0, %p50_p4 }
  0x30   : > { %p1295_p13 = por %p57_p1, %p56_p11  ;;  %s684_s21 = sshll.u32 %s204_s15, 4 }
  0x31   : > { %p1550_p7 = scmp.lt.s32.totalorder %s1123_s6, 8  ;;  %s208_s24 = scalar_lea.vmem [#allocation5], %s684_s21 }
  0x32   : > { %s216_s8 = sshll.u32 %s208_s24, 4  ;;  %s205_s5 = scalar_lea.sflag [#allocation6], %s204_s15  ;;  %s217_s8 = int_to_ptr.vmem [resolvable:$true] %s216_s8 }
  0x33   : > { %p1301_p8 = pnand %p1550_p7, %p52_p12  ;;  %s1126_s16 = smov [#allocation5]  }
  0x34   : > { %s921_s12 = sshll.u32 %s1126_s16, 4  ;;  %s922_s12 = int_to_ptr.vmem [resolvable:$false] %s921_s12 }
  0x35   : > { %s214_s14 = scalar_lea.hbm %s1548_s0, %s704_s10  ;;  %p905_p9 = pneg %p1301_p8 }
  0x36   : > { %s916_s10 = scalar_lea.vmem %s217_s8, 256  ;;  %s923_s0 = scalar_lea.vmem %s922_s12, 512 }
  0x37   : > { %p917_p2 = scmp.ne.s32.totalorder %s217_s8, %s916_s10  ;;  %p924_p4 = scmp.lt.s32.totalorder %s217_s8, %s922_s12 }
  0x38   : > { %p925_p11 = scmp.lt.s32.totalorder %s923_s0, %s916_s10 }
  0x39   : > { %p919_p3 = pnand %p917_p2, %p905_p9 }
  0x3a   : > { %p926_p12 = por %p925_p11, %p924_p4 }
  0x3b   : > { %p920_p5 = pneg %p919_p3 }
  0x3d   : > { %p927_p7 = pnand %p926_p12, %p920_p5 }
  0x3f   : > { %930 = shalt.err (!%p927_p7)
}
  0x40   : > { %727 = dma.hbm_to_vmem [thread:$0]  (!%p1301_p8), %s214_s14, 256, %s217_s8, %s205_s5  }
  0x41   : > { %s33_s0 = sadd.s32 1, %s1115_s29  ;;  %s36_s15 = sadd.s32 1, %s1119_s30 }
  0x42   : > { %p34_p9 = scmp.ge.s32.totalorder %s33_s0, 4  ;;  %s66_s21 = sadd.s32 2, %s1119_s30 }
  0x43   : > { %s680_s13 = sshll.u32 %s1115_s29, 1  ;;  %s101_s5 = sadd.s32 1, %s1079_s20 }
  0x44   : > { %s1591_s0 = smov (%p34_p9, %s33_s0), 0  ;;  %s1593_s15 = smov (!%p34_p9, %s36_s15), %s1119_s30 }
  0x45   : > { %1552 = sst [smem:[#allocation26_spill]] %s1591_s0  ;;  %s95_s24 = sadd.s32 %s1119_s30, %s680_s13 }
  0x46   : > { %s681_s10 = sshll.u32 %s1591_s0, 1  ;;  %p38_p2 = scmp.ge.s32.totalorder %s1593_s15, 2 }
  0x47   : > { %p108_p8 = scmp.ne.s32.totalorder %s1079_s20, %s1075_s19  ;;  %p114_p3 = scmp.ne.s32.totalorder %s1075_s19, %s1071_s18 }
  0x48   : > { %s1595_s15 = smov (%p38_p2, %s1593_s15), 0  ;;  %s1556_s1 = sadd.s32 1, %s1103_s26 }
  0x49   : > { %p1327_p5 = por %p108_p8, %p51_p0  ;;  %p1333_p4 = por %p114_p3, %p57_p1 }
  0x4a   : > { %s40_s16 = ssub.s32 %s1119_s30, %s1595_s15  ;;  %s67_s12 = sadd.s32 2, %s1595_s15 }
  0x4b   : > { %s1554_s8 = scalar_select %p1333_p4, 1, 0 }
  0x4c   : > { %p41_p11 = scmp.eq.s32.totalorder %s40_s16, 0  ;;  %s68_s18 = ssub.s32 %s66_s21, %s67_s12 }
  0x4d   : > { %1555 = sst [smem:[#allocation27_spill]] %s1554_s8  ;;  %p69_p12 = scmp.eq.s32.totalorder %s68_s18, 0 }
  0x4e   : > { %s97_s13 = sadd.s32 %s681_s10, %s1595_s15  ;;  %s1557_s29 = sadd.s32 1, %s1091_s23 }
  0x4f   : > { %s1344_s0 = scalar_select %p41_p11, %s1103_s26, %s1556_s1  }
  0x50   : > { %s1349_s3 = scalar_select %p69_p12, %s1091_s23, %s1557_s29  }
  0x51   : > { %s98_s27 = ssub.s32 %s95_s24, %s97_s13  ;;  %s245_s28 = sand.u32 1, %s1079_s20  }
  0x52   : > { %p99_p0 = scmp.eq.s32.totalorder %s98_s27, 0  ;;  %s689_s19 = sshll.u32 %s245_s28, 4 }
  0x53   : > { %s705_s9 = sshll.u32 %s95_s24, 8  ;;  %s247_s21 = scalar_lea.vmem [#allocation11], %s689_s19 }
  0x54   : > { %s1353_s8 = scalar_select %p99_p0, %s1079_s20, %s101_s5  }
  0x55   : > { %s255_s22 = scalar_lea.hbm %s1513_s2, %s705_s9  ;;  %s257_s12 = sshll.u32 %s247_s21, 4  ;;  %s258_s12 = int_to_ptr.vmem [resolvable:$true] %s257_s12 }
  0x56   : > { %p1558_p1 = scmp.lt.s32.totalorder %s1123_s6, 8  ;;  %s944_s27 = scalar_lea.vmem %s258_s12, 256 }
  0x57   : > { %p945_p2 = scmp.ne.s32.totalorder %s258_s12, %s944_s27  ;;  %s1127_s28 = smov [#allocation11]  }
  0x58   : > { %p1362_p7 = pnand %p1558_p1, %p1327_p5  ;;  %s949_s29 = sshll.u32 %s1127_s28, 4  ;;  %s950_s29 = int_to_ptr.vmem [resolvable:$false] %s949_s29 }
  0x59   : > { %s951_s30 = scalar_lea.vmem %s950_s29, 512  ;;  %p952_p11 = scmp.lt.s32.totalorder %s258_s12, %s950_s29 }
  0x5a   : > { %p933_p9 = pneg %p1362_p7  ;;  %p953_p12 = scmp.lt.s32.totalorder %s951_s30, %s944_s27 }
  0x5c   : > { %p947_p8 = pnand %p945_p2, %p933_p9  ;;  %p954_p0 = por %p953_p12, %p952_p11 }
  0x5e   : > { %p948_p3 = pneg %p947_p8 }
  0x60   : > { %p955_p4 = pnand %p954_p0, %p948_p3 }
  0x62   : > { %958 = shalt.err (!%p955_p4)
}
  0x63   : > { %733 = dma.hbm_to_vmem [thread:$0]  (!%p1362_p7), %s255_s22, 256, %s258_s12, %s1265_s4  }
  0x64   : > { %266 = sbr.rel (%p1276_p10) target bundleno = 1059 (0x423), region = 36  ;;  %s268_s19 = sand.u32 (!%p1276_p10), 1, %s1099_s25  }
  0x65   : > { %s1374_s9 = sshll.u32 (!%p1276_p10), %s268_s19, 4  ;;  %s269_s24 = scalar_lea.sflag (!%p1276_p10), [#allocation6], %s268_s19 }
  0x66   : > { %s272_s10 = scalar_lea.vmem (!%p1276_p10), [#allocation5], %s1374_s9 }
  0x69   : > { %1050 = dma.done.wait (%p1295_p13), %s269_s24, 256  }
  0x6a   : > { %1052 = vsyncadd (%p1295_p13), %s269_s24, 4294967040  ;;  %s1560_s5 = sld [smem:[#allocation20_spill]]  ;;  %s277_s4 = sand.u32 1, %s1232_s7  }
  0x6b   : > { %s278_s18 = scalar_lea.sflag [#allocation10], %s277_s4 }
  0x70   : > { %s279_s22 = sand.u32 1, %s1560_s5  }
  0x71   : > { %s1383_s11 = sshll.u32 %s279_s22, 4 }
  0x72   : > { %s281_s13 = scalar_lea.vmem [#allocation9], %s1383_s11 }
  0x73   : > { %1054 = dma.done.wait (%p1245_p6), %s278_s18, 256  }
  0x74   : > { %1056 = vsyncadd (%p1245_p6), %s278_s18, 4294967040  ;;  %s1562_s16 = sld [smem:[#allocation19_spill]] }
  0x75   : > { %s1563_s21 = sld [smem:[#allocation27_spill]] }
  0x7a   : > { %s288_s12 = sand.u32 1, %s1562_s16  }
  0x7b   : > { %s1391_s17 = sshll.u32 %s288_s12, 4  ;;  %p1564_p10 = scmp.ne.s32.totalorder %s1563_s21, 0 }
  0x7c   : > { %s290_s1 = scalar_lea.vmem [#allocation11], %s1391_s17 }
  0x7d   : > { %1058 = dma.done.wait (%p1564_p10), %s278_s18, 256  }
  0x7e   : > { %1060 = vsyncadd (%p1564_p10), %s278_s18, 4294967040  ;;  %s1565_s27 = sld [smem:[#allocation22_spill]] }
  0x7f   : > { %s1566_s28 = sld [smem:[#allocation21_spill]] }
  0x84   : > { %p325_p13 = scmp.eq.s32.totalorder %s1565_s27, 0  ;;  %p329_p4 = scmp.eq.s32.totalorder %s1565_s27, 1 }
  0x85   : > { %p326_p5 = scmp.eq.s32.totalorder %s1566_s28, 0  ;;  %p330_p6 = scmp.eq.s32.totalorder %s1566_s28, 3 }
  0x87   : > { %p327_p1 = pnand %p326_p5, %p325_p13  ;;  %p1402_p7 = pnand %p330_p6, %p329_p4 }
  0x88   : > { %s1128_s30 = smov (!%p327_p1), 0.0  }
  0x89   : > { %334 = sbr.rel (%p327_p1) target bundleno = 146 (0x92), region = 52  ;;  %336 = sst [smem:[#allocation4]] (!%p327_p1), %s1128_s30 }
  0x8e   : > { %v337_v0 = vlaneseq  ;;  %v1129_v1 = vmov 0.0  }
  0x90   : > { %vm339_vm0 = vcmp.lt.s32.totalorder %v337_v0, 256 }
  0x91   : > { %341 = vst.msk [vmem:[#allocation3] sm:$0x3] %vm339_vm0, %v1129_v1 }
  0x92 PF: > { %s1568_s19 = sld [smem:[#allocation21_spill]] }
  0x98   : > { %p697_p9 = scmp.ne.s32.totalorder %s1568_s19, 0 }
  0x99   : > { %s1569_s14 = sld [smem:[#allocation30_spill]] (!%p697_p9) }
  0x9a   : > { %344 = sbr.rel (%p697_p9) target bundleno = 491 (0x1eb), region = 56 }
  0x9f   : > { %v346_v2 = vld [vmem:[%s272_s10] sm:$0xff]  ;;  %v347_v3 = vld [vmem:[%s272_s10 + $0x8] sm:$0xff]  ;;  %v383_v4 = vlaneseq  ;;  %v1130_v15 = vmov 1966171168  }
  0xa0   : > { %v351_v5 = vrot.slane %v346_v2, 4  ;;  %v357_v6 = vrot.slane %v347_v3, 4  ;;  %v348_v7 = vld [vmem:[%s281_s13] sm:$0xff]  ;;  %v349_v8 = vld [vmem:[%s281_s13 + $0x8] sm:$0xff]  ;;  %v381_v16 = vunpack.c.l.s4 %v1130_v15 }
  0xa1   : > { %v384_v9 = vshrl.u32 %v383_v4, 7  ;;  %v363_v10 = vrot.slane %v348_v7, 4  ;;  %v369_v11 = vrot.slane %v349_v8, 4  ;;  %v345_v12 = vld [vmem:[%s1569_s14] sm:$0x3]  ;;  %vm398_vm1 = vcmp.lt.s32.totalorder %v383_v4, 256 }
  0xa2   : > { %v352_v13 = vadd.f32 %v351_v5, %v346_v2  ;;  %v358_v14 = vadd.f32 %v357_v6, %v347_v3  ;;  %v382_v29 = vunpack.c.0.s8 %v381_v16  ;;  %v350_v55 = vld [vmem:[#allocation3] sm:$0x3] }
  0xa3   : > { %v404_v17 = vsub.s32 0, %v384_v9  ;;  %v408_v18 = vsub.s32 1, %v384_v9  ;;  %v364_v19 = vadd.f32 %v363_v10, %v348_v7  ;;  %v370_v20 = vadd.f32 %v369_v11, %v349_v8 }
  0xa4   : > { %v353_v21 = vrot.slane %v352_v13, 2  ;;  %v359_v22 = vrot.slane %v358_v14, 2  ;;  %v385_v49 = vsub.s32 %v382_v29, %v384_v9 }
  0xa5   : > { %v405_v23 = vrot.slane %v345_v12, %v404_v17  ;;  %v409_v24 = vrot.slane %v345_v12, %v408_v18  ;;  %v365_v25 = vrot.slane %v364_v19, 2  ;;  %v371_v26 = vrot.slane %v370_v20, 2 }
  0xa6   : > { %v354_v27 = vadd.f32 %v353_v21, %v352_v13  ;;  %v360_v28 = vadd.f32 %v359_v22, %v358_v14 }
  0xa7   : > { %v412_v30 = vsub.f32 %v346_v2, %v405_v23  ;;  %v413_v31 = vsub.f32 %v347_v3, %v409_v24  ;;  %v366_v32 = vadd.f32 %v365_v25, %v364_v19  ;;  %v372_v33 = vadd.f32 %v371_v26, %v370_v20 }
  0xa8   : > { %v355_v34 = vrot.slane %v354_v27, 1  ;;  %v361_v35 = vrot.slane %v360_v28, 1  ;;  %v433_v36 = vsub.f32 %v348_v7, %v405_v23  ;;  %v434_v37 = vsub.f32 %v349_v8, %v409_v24 }
  0xa9   : > { %v414_v38 = vmul.f32 18.181818, %v412_v30  ;;  %v415_v39 = vmul.f32 18.181818, %v413_v31  ;;  %v367_v40 = vrot.slane %v366_v32, 1  ;;  %v373_v41 = vrot.slane %v372_v33, 1 }
  0xaa   : > { %v356_v42 = vadd.f32 %v355_v34, %v354_v27  ;;  %v362_v43 = vadd.f32 %v361_v35, %v360_v28  ;;  %v435_v44 = vmul.f32 18.181818, %v433_v36  ;;  %v436_v45 = vmul.f32 18.181818, %v434_v37 }
  0xab   : > { %v416_v46 = vmax.f32 %v414_v38, %v415_v39  ;;  %v368_v47 = vadd.f32 %v367_v40, %v366_v32  ;;  %v374_v48 = vadd.f32 %v373_v41, %v372_v33 }
  0xac   : > { %v437_v52 = vmax.f32 %v435_v44, %v436_v45 }
  0xad   : > { %417 = vmax.xlane.f32.xlu0 %v416_v46  ;;  %v375_v50 = vadd.f32 %v368_v47, %v356_v42  ;;  %v376_v51 = vadd.f32 %v374_v48, %v362_v43 }
  0xaf   : > { %v379_v53 = vcombine.low %v375_v50, %v376_v51 }
  0xb1   : > { %v386_v54 = vrot.slane %v379_v53, %v385_v49  ;;  %438 = vmax.xlane.f32.xlu0 %v437_v52 }
  0xb3   : > { %v393_v56 = vrot.slane %v386_v54, %v385_v49 }
  0xb5   : > { %v395_v57 = vadd.f32 %v393_v56, %v350_v55 }
  0xb7   : > { %400 = vst.msk [vmem:[#allocation3] sm:$0x3] %vm398_vm1, %v395_v57 }
 0x136   : > { %v418_v58 = vpop.xlane.xlu0 %417 }
 0x137   : > { %v419_v59 = vsub.f32 %v414_v38, %v418_v58  ;;  %v420_v60 = vsub.f32 %v415_v39, %v418_v58 }
 0x139   : > { %v421_v61 = vmul.f32 1.442695, %v419_v59  ;;  %v423_v62 = vmul.f32 1.442695, %v420_v60 }
 0x13a   : > { %v439_v63 = vpop.xlane.xlu0 %438 }
 0x13b   : > { %856 = vpow2.f32 %v421_v61  ;;  %v440_v0 = vsub.f32 %v435_v44, %v439_v63  ;;  %v441_v1 = vsub.f32 %v436_v45, %v439_v63 }
 0x13c   : > { %858 = vpow2.f32 %v423_v62 }
 0x13d   : > { %v442_v2 = vmul.f32 1.442695, %v440_v0  ;;  %v444_v3 = vmul.f32 1.442695, %v441_v1 }
 0x13f   : > { %860 = vpow2.f32 %v442_v2 }
 0x140   : > { %862 = vpow2.f32 %v444_v3 }
 0x148   : > { %v857_v5 = vpop.eup %856 }
 0x149   : > { %v859_v6 = vpop.eup %858 }
 0x14a   : > { %v425_v7 = vadd.f32 %v859_v6, %v857_v5 }
 0x14c   : > { %v861_v4 = vpop.eup %860  ;;  %426 = vadd.xlane.f32.xlu1 %v425_v7 }
 0x14d   : > { %v863_v8 = vpop.eup %862 }
 0x14e   : > { %v446_v9 = vadd.f32 %v863_v8, %v861_v4 }
 0x150   : > { %447 = vadd.xlane.f32.xlu1 %v446_v9 }
 0x1d5   : > { %v427_v10 = vpop.xlane.xlu1 %426 }
 0x1d6   : > { %864 = vrcp.f32 %v427_v10 }
 0x1d9   : > { %v448_v11 = vpop.xlane.xlu1 %447 }
 0x1da   : > { %866 = vrcp.f32 %v448_v11 }
 0x1e3   : > { %v865_v12 = vpop.eup %864 }
 0x1e4   : > { %v429_v13 = vmul.f32 %v865_v12, %v857_v5  ;;  %v430_v14 = vmul.f32 %v865_v12, %v859_v6 }
 0x1e6   : > { %431 = vst [vmem:[#allocation2 + $0x10] sm:$0xff] %v429_v13  ;;  %432 = vst [vmem:[#allocation2] sm:$0xff] %v430_v14 }
 0x1e7   : > { %v867_v15 = vpop.eup %866 }
 0x1e8   : > { %v450_v16 = vmul.f32 %v867_v15, %v861_v4  ;;  %v451_v17 = vmul.f32 %v867_v15, %v863_v8 }
 0x1ea   : > { %453 = vst [vmem:[#allocation2 + $0x18] sm:$0xff] %v450_v16  ;;  %454 = vst [vmem:[#allocation2 + $0x8] sm:$0xff] %v451_v17 }
 0x1eb PF: > { %v455_v18 = vld [vmem:[%s290_s1] sm:$0xff]  ;;  %v456_v19 = vld [vmem:[%s290_s1 + $0x8] sm:$0xff]  ;;  %s1570_s9 = sld [smem:[#allocation21_spill]]  ;;  %vm494_vm2 = vcmask 7168  }
 0x1ec   : > { %v457_v20 = vmul.f32 10.0, %v455_v18  ;;  %v458_v21 = vmul.f32 10.0, %v456_v19  ;;  %s1423_s10 = scalar_select %p697_p9, 1, 0 }
 0x1ed   : > { %v479_v32 = vld [vmem:[#allocation2 + $0x10] sm:$0xff]  ;;  %v480_v33 = vld [vmem:[#allocation2] sm:$0xff]  ;;  %s520_s16 = sld [smem:[#allocation4]] }
 0x1ee   : > { %v459_v22 = vmax.f32 %v457_v20, %v458_v21  ;;  %s475_s22 = scvt.s32.f32 %s1423_s10  ;;  %s1571_s5 = sld [smem:[#allocation30_spill]] (!%p1402_p7) }
 0x1f0   : > { %460 = vmax.xlane.f32.xlu0 %v459_v22  ;;  %v481_v34 = vstv %s475_s22 }
 0x1f1   : > { %p476_p2 = scmp.ne.s32.totalorder %s1570_s9, 1  ;;  %v485_v35 = vld [vmem:[#allocation2 + $0x18] sm:$0xff]  ;;  %v486_v36 = vld [vmem:[#allocation2 + $0x8] sm:$0xff]  ;;  %v482_v38 = vmul.f32 %v481_v34, %v479_v32  ;;  %v483_v39 = vmul.f32 %v481_v34, %v480_v33 }
 0x1f3   : > { %s1425_s4 = scalar_select %p476_p2, 1, 0 }
 0x1f5   : > { %s478_s11 = scvt.s32.f32 %s1425_s4 }
 0x1f7   : > { %v487_v37 = vstv %s478_s11  ;;  %s492_s18 = sadd.f32 %s478_s11, %s475_s22 }
 0x1f8   : > { %v488_v40 = vmul.f32 %v487_v37, %v485_v35  ;;  %v489_v41 = vmul.f32 %v487_v37, %v486_v36 }
 0x1fa   : > { %v490_v42 = vadd.f32 %v488_v40, %v482_v38  ;;  %v491_v43 = vadd.f32 %v489_v41, %v483_v39 }
 0x1fc   : > { %v506_v46 = vmul.f32 %v490_v42, %v455_v18  ;;  %v507_v47 = vmul.f32 %v491_v43, %v456_v19 }
 0x1fe   : > { %v508_v50 = vadd.f32 %v507_v47, %v506_v46 }
 0x279   : > { %v461_v23 = vpop.xlane.xlu0 %460 }
 0x27a   : > { %v462_v24 = vsub.f32 %v457_v20, %v461_v23  ;;  %v463_v25 = vsub.f32 %v458_v21, %v461_v23 }
 0x27c   : > { %v464_v26 = vmul.f32 1.442695, %v462_v24  ;;  %v466_v27 = vmul.f32 1.442695, %v463_v25 }
 0x27e   : > { %868 = vpow2.f32 %v464_v26 }
 0x27f   : > { %870 = vpow2.f32 %v466_v27 }
 0x28b   : > { %v869_v28 = vpop.eup %868 }
 0x28c   : > { %v871_v29 = vpop.eup %870 }
 0x28d   : > { %v468_v30 = vadd.f32 %v871_v29, %v869_v28 }
 0x28f   : > { %469 = vadd.xlane.f32.xlu0 %v468_v30 }
 0x318   : > { %v470_v31 = vpop.xlane.xlu0 %469 }
 0x319   : > { %872 = vlog2.f32 %v470_v31 }
 0x326   : > { %v873_v44 = vpop.eup %872 }
 0x327   : > { %v472_v45 = vmul.f32 0.6931472, %v873_v44 }
 0x329   : > { %v493_v48 = vadd.f32 %v472_v45, %v461_v23 }
 0x32b   : > { %v495_v49 = vsel %vm494_vm2, %v493_v48, 0.0 }
 0x32c   : > { %496 = vadd.xlane.f32.xlu1 %v495_v49 }
 0x330   : > { %509 = vadd.xlane.f32.xlu1 %v508_v50 }
 0x3b5   : > { %v497_v51 = vpop.xlane.xlu1 %496 }
 0x3b6   : > { %v498_v52 = vrot.slane %v497_v51, 4 }
 0x3b8   : > { %v499_v53 = vadd.f32 %v498_v52, %v497_v51 }
 0x3b9   : > { %v510_v54 = vpop.xlane.xlu1 %509 }
 0x3ba   : > { %v500_v55 = vrot.slane %v499_v53, 2  ;;  %v511_v56 = vrot.slane %v510_v54, 4 }
 0x3bc   : > { %v512_v57 = vadd.f32 %v511_v56, %v510_v54  ;;  %v501_v58 = vadd.f32 %v500_v55, %v499_v53 }
 0x3be   : > { %v513_v59 = vrot.slane %v512_v57, 2  ;;  %v502_v60 = vrot.slane %v501_v58, 1 }
 0x3c0   : > { %v514_v61 = vadd.f32 %v513_v59, %v512_v57  ;;  %v503_v62 = vadd.f32 %v502_v60, %v501_v58 }
 0x3c2   : > { %706 = vpush %v503_v62  ;;  %v515_v63 = vrot.slane %v514_v61, 1 }
 0x3c4   : > { %v516_v0 = vadd.f32 %v515_v63, %v514_v61 }
 0x3c6   : > { %708 = vpush %v516_v0 }
 0x3f3   : > { %s707_s13 = spop %706 }
 0x3f4   : > { %s505_s21 = smul.f32 %s707_s13, %s492_s18 }
 0x3f7   : > { %s709_s12 = spop %708 }
 0x3f8   : > { %s518_s17 = smul.f32 10.0, %s709_s12 }
 0x3fa   : > { %s519_s1 = ssub.f32 %s505_s21, %s518_s17 }
 0x3fc   : > { %s521_s27 = smul.f32 0.010416667, %s519_s1 }
 0x3fd   : > { %526 = sbr.rel (%p1402_p7) target bundleno = 1034 (0x40a), region = 60 }
 0x3fe   : > { %s522_s28 = sadd.f32 %s521_s27, %s520_s16 }
 0x400   : > { %524 = sst [smem:[#allocation4]] %s522_s28 }
 0x401   : > { %s527_s30 = sld [smem:[#allocation4]] (!%p1402_p7) }
 0x402   : > { %v530_v1 = vld [vmem:[#allocation3] sm:$0x3]  ;;  %v536_v3 = vlaneseq }
 0x403   : > { %v532_v2 = vld [vmem:[%s1571_s5] sm:$0x3]  ;;  %v531_v5 = vmul.f32 0.03125, %v530_v1 }
 0x404   : > { %v533_v6 = vmul.f32 0.9, %v532_v2  ;;  %vm538_vm3 = vcmp.lt.s32.totalorder %v536_v3, 256 }
 0x405   : > { %v534_v7 = vmul.f32 0.1, %v531_v5 }
 0x407   : > { %v535_v4 = vadd.f32 %v534_v7, %v533_v6  ;;  %529 = sst [smem:[#allocation12]] %s527_s30 }
 0x409   : > { %540 = vst.msk [vmem:[#allocation13] sm:$0x3] %vm538_vm3, %v535_v4 }
 0x40a PF: > { %p735_p8 = scmp.eq.s32.totalorder %s1232_s7, 7  ;;  %s1131_s29 = smov [#allocation12]  }
 0x40b   : > { %s1572_s10 = sld [smem:[#allocation31_spill]]  ;;  %s1132_s4 = smov [#allocation13]  }
 0x40c   : > { %s557_s22 = sshll.u32 %s1132_s4, 4  ;;  %s558_s22 = int_to_ptr.vmem [resolvable:$true] %s557_s22 }
 0x40d   : > { %s969_s11 = scalar_lea.vmem %s558_s22, 32  ;;  %p976_p0 = scmp.lt.s32.totalorder %s558_s22, %s558_s22 }
 0x40e   : > { %p970_p3 = scmp.ne.s32.totalorder %s558_s22, %s969_s11  ;;  %p977_p10 = scmp.lt.s32.totalorder %s969_s11, %s969_s11 }
 0x410   : > { %p971_p11 = pnand %p970_p3, %p735_p8  ;;  %p978_p13 = por %p977_p10, %p976_p0 }
 0x411   : > { %717 = dma.smem_to_hbm (%p735_p8), %s1131_s29, 16, %s1572_s10, [#allocation8]  }
 0x412   : > { %p972_p12 = pneg %p971_p11 }
 0x414   : > { %p979_p5 = pnand %p978_p13, %p972_p12 }
 0x416   : > { %982 = shalt.err (!%p979_p5)
}
 0x417   : > { %s1573_s16 = sld [smem:[#allocation32_spill]] }
 0x41d   : > { %719 = dma.vmem_to_hbm [thread:$0]  (%p735_p8), %s558_s22, 32, %s1573_s16, [#allocation7]  }
 0x41e   : > { %1062 = dma.done.wait (%p735_p8), [#allocation8], 16  }
 0x41f   : > { %1064 = vsyncadd (%p735_p8), [#allocation8], 4294967280 }
 0x420   : > { %1066 = dma.done.wait (%p735_p8), [#allocation7], 32  }
 0x421   : > { %1068 = vsyncadd (%p735_p8), [#allocation7], 4294967264 }
 0x422   : > { %569 = sfence }
 0x423 PF: > { %s24_s6 = sadd.s32 1, %s1123_s6   ;;  %s1575_s18 = sld [smem:[#allocation19_spill]] }
 0x424   : > { %p1464_p4 = scmp.ge.s32.totalorder %s24_s6, 10   ;;  %s1576_s12 = sld [smem:[#allocation20_spill]] }
 0x425   : > { %s1577_s27 = sld [smem:[#allocation23_spill]]  ;;  %s1581_s19 = smov %s1079_s20 }
 0x426   : > { %s1578_s28 = sld [smem:[#allocation24_spill]]  ;;  %s1582_s20 = smov %s1353_s8 }
 0x427   : > { %s1579_s29 = sld [smem:[#allocation26_spill]]  ;;  %s1584_s22 = smov %s1091_s23 }
 0x428   : > { %s1585_s23 = smov %s1349_s3  ;;  %s1586_s24 = smov %s1099_s25 }
 0x429   : > { %s1587_s25 = smov %s1103_s26  ;;  %s1588_s26 = smov %s1344_s0 }
 0x42a   : > { %s1583_s21 = smov %s1576_s12  ;;  %s1589_s30 = smov %s1595_s15 }
 0x42b   :  { %23 = sbr.rel (!%p1464_p4) target bundleno = 18 (0x12), region = 123 }
 0x430   :  { %575 = vsyncpa [#allocation6], 1 }
 0x431   :  { %577 = vsyncpa [#allocation6 + $0x1], 1 }
 0x432   :  { %578 = vsyncpa [#allocation10], 1 }
 0x433   :  { %580 = vsyncpa [#allocation10 + $0x1], 1 }
 0x434   :  { %581 = vsyncpa [#allocation7], 1 }
 0x435   :  { %583 = vsyncpa [#allocation7 + $0x1], 1 }
 0x436   :  { %584 = vsyncpa [#allocation8], 1 }
 0x437   :  { %586 = vsyncpa [#allocation8 + $0x1], 1 }

</bundles_post_ra>
